<compile_context>
chip_gen: v7x
topology: tpu7x:2x2x1
jax: 0.10.0
libtpu: 0.0.40
codegen_flags: <defaults>
</compile_context>

<pallas_src>
import jax
import jax.numpy as jnp
from jax.experimental import pallas as pl
from jax.experimental.pallas import tpu as pltpu

TEXT_IN = 32
IMG_C, IMG_H, IMG_W = 4, 16, 16
IMG_IN = IMG_C * IMG_H * IMG_W          # 1024
FEAT = 256                              # per-sub-model feature dim; concat -> 512
HIDDEN = 128
TB = 128                                # batch tile: multiple of 8, fills MXU M dim


def fusion_kernel(t_ref, i_ref, a_ref, bm_ref, beff_ref, w2t_ref, b2_ref, out_ref):
    # Fused encoders + first classifier layer (f32 accumulation on the MXU).
    h = (jnp.dot(t_ref[...], a_ref[...], preferred_element_type=jnp.float32)
         + jnp.dot(i_ref[...], bm_ref[...], preferred_element_type=jnp.float32)
         + beff_ref[...])
    h = jnp.maximum(h, 0.0)                                   # ReLU
    # Linear(128, 1) as VPU multiply + XLU lane reduction (avoids an N=1 matmul).
    logit = jnp.sum(h * w2t_ref[...], axis=-1, keepdims=True) + b2_ref[...]
    # Sigmoid: exp and approximate reciprocal both ride the EUP slot.
    out_ref[...] = pl.reciprocal(1.0 + jnp.exp(-logit), approx=True)


def init_params(key):
    ks = jax.random.split(key, 10)
    scale = 0.02
    return {
        # text_model: Linear(TEXT_IN -> FEAT)   (weights stored (in, out))
        "wt": scale * jax.random.normal(ks[0], (TEXT_IN, FEAT), jnp.float32),
        "bt": scale * jax.random.normal(ks[1], (1, FEAT), jnp.float32),
        # image_model: Linear(IMG_IN -> FEAT)
        "wi": scale * jax.random.normal(ks[2], (IMG_IN, FEAT), jnp.float32),
        "bi": scale * jax.random.normal(ks[3], (1, FEAT), jnp.float32),
        # classifier Linear(512, 128), stored as the two 256-row halves
        "w1t": scale * jax.random.normal(ks[4], (FEAT, HIDDEN), jnp.float32),
        "w1i": scale * jax.random.normal(ks[5], (FEAT, HIDDEN), jnp.float32),
        "b1": scale * jax.random.normal(ks[6], (1, HIDDEN), jnp.float32),
        # classifier Linear(128, 1)
        "w2": scale * jax.random.normal(ks[7], (HIDDEN, 1), jnp.float32),
        "b2": scale * jax.random.normal(ks[8], (1, 1), jnp.float32),
    }


def fusion_forward(text_input, image_input, params, tb=TB):
    B = text_input.shape[0]
    img_flat = image_input.reshape(B, -1).astype(jnp.float32)  # NCHW -> (B, C*H*W)

    # --- fold linear encoders into the first classifier layer (host-side, f32) ---
    a_eff = (params["wt"] @ params["w1t"]).astype(jnp.bfloat16)        # (32, 128)
    bm_eff = (params["wi"] @ params["w1i"]).astype(jnp.bfloat16)       # (1024, 128)
    bias_eff = (params["bt"] @ params["w1t"]
                + params["bi"] @ params["w1i"]
                + params["b1"]).astype(jnp.float32)                    # (1, 128)
    w2t = params["w2"].T.astype(jnp.float32)                           # (1, 128)
    b2 = params["b2"].astype(jnp.float32)                              # (1, 1)

    # --- pad batch to a multiple of the tile and cast operands to bf16 ---
    b_pad = ((B + tb - 1) // tb) * tb
    t_p = jnp.zeros((b_pad, TEXT_IN), jnp.bfloat16).at[:B].set(
        text_input.astype(jnp.bfloat16))
    i_p = jnp.zeros((b_pad, IMG_IN), jnp.bfloat16).at[:B].set(
        img_flat.astype(jnp.bfloat16))

    grid = (b_pad // tb,)
    out = pl.pallas_call(
        fusion_kernel,
        out_shape=jax.ShapeDtypeStruct((b_pad, 1), jnp.float32),
        grid_spec=pltpu.PrefetchScalarGridSpec(
            num_scalar_prefetch=0,
            grid=grid,
            in_specs=[
                pl.BlockSpec((tb, TEXT_IN), lambda i: (i, 0)),      # text rows
                pl.BlockSpec((tb, IMG_IN), lambda i: (i, 0)),       # image rows
                pl.BlockSpec((TEXT_IN, HIDDEN), lambda i: (0, 0)),  # A (resident)
                pl.BlockSpec((IMG_IN, HIDDEN), lambda i: (0, 0)),   # Bm (resident)
                pl.BlockSpec((1, HIDDEN), lambda i: (0, 0)),        # b_eff
                pl.BlockSpec((1, HIDDEN), lambda i: (0, 0)),        # w2^T
                pl.BlockSpec((1, 1), lambda i: (0, 0)),             # b2
            ],
            out_specs=pl.BlockSpec((tb, 1), lambda i: (i, 0)),
        ),
        compiler_params=pltpu.CompilerParams(
            dimension_semantics=("parallel",),          # shard batch tiles across TCs
            vmem_limit_bytes=32 * 1024 * 1024,          # explicit: safe on 64 MiB v7x
        ),
    )(t_p, i_p, a_eff, bm_eff, bias_eff, w2t, b2)
    return out[:B]


def reference_forward(text_input, image_input, params):
    # pure-JAX f32 reference mirroring the original PyTorch module structure
    t = text_input.astype(jnp.float32) @ params["wt"] + params["bt"]
    i = (image_input.reshape(image_input.shape[0], -1).astype(jnp.float32)
         @ params["wi"] + params["bi"])
    combined = jnp.concatenate([t, i], axis=1)                  # (B, 512)
    w1 = jnp.concatenate([params["w1t"], params["w1i"]], axis=0)
    h = jnp.maximum(combined @ w1 + params["b1"], 0.0)
    return jax.nn.sigmoid(h @ params["w2"] + params["b2"])


if __name__ == "__main__":
    key = jax.random.PRNGKey(0)
    k_params, k_text, k_img, k_text2, k_img2 = jax.random.split(key, 5)
    params = init_params(k_params)

    # small demo shapes consistent with the module
    B = 2
    text_input = jax.random.normal(k_text, (B, TEXT_IN), jnp.float32)
    image_input = jax.random.normal(k_img, (B, IMG_C, IMG_H, IMG_W), jnp.float32)

    out = fusion_forward(text_input, image_input, params)
    out = jax.block_until_ready(out)
    ref = reference_forward(text_input, image_input, params)
    assert out.shape == (B, 1)
    assert jnp.allclose(out, ref, atol=2e-2, rtol=2e-2), (out, ref)

    # multi-tile check: batch larger than one tile (exercises grid + padding)
    B2 = 300
    text2 = jax.random.normal(k_text2, (B2, TEXT_IN), jnp.float32)
    img2 = jax.random.normal(k_img2, (B2, IMG_C, IMG_H, IMG_W), jnp.float32)
    out2 = jax.block_until_ready(fusion_forward(text2, img2, params))
    ref2 = reference_forward(text2, img2, params)
    assert out2.shape == (B2, 1)
    assert jnp.allclose(out2, ref2, atol=2e-2, rtol=2e-2)

    print("KERNEL_OK")
</pallas_src>

<mosaic_0001>
module attributes {stable_mosaic.version = 11 : i64} {
  func.func @fusion_kernel(%arg0: i32, %arg1: memref<128x32xbf16, #tpu.memory_space<vmem>>, %arg2: memref<128x1024xbf16, #tpu.memory_space<vmem>>, %arg3: memref<32x128xbf16, #tpu.memory_space<vmem>>, %arg4: memref<1024x128xbf16, #tpu.memory_space<vmem>>, %arg5: memref<1x128xf32, #tpu.memory_space<vmem>>, %arg6: memref<1x128xf32, #tpu.memory_space<vmem>>, %arg7: memref<1x1xf32, #tpu.memory_space<vmem>>, %arg8: memref<128x1xf32, #tpu.memory_space<vmem>>) attributes {dimension_semantics = [#tpu.dimension_semantics<parallel>], iteration_bounds = array<i64: 1>, scalar_prefetch = 0 : i64, scratch_operands = 0 : i64, tpu.core_type = #tpu.core_type<tc>, window_params = [{transform_indices = @transform_0, window_bounds = array<i64: 128, 32>}, {transform_indices = @transform_1, window_bounds = array<i64: 128, 1024>}, {pipeline_mode = #tpu.pipeline_mode<synchronous>, transform_indices = @transform_2, window_bounds = array<i64: 32, 128>}, {pipeline_mode = #tpu.pipeline_mode<synchronous>, transform_indices = @transform_3, window_bounds = array<i64: 1024, 128>}, {pipeline_mode = #tpu.pipeline_mode<synchronous>, transform_indices = @transform_4, window_bounds = array<i64: 1, 128>}, {pipeline_mode = #tpu.pipeline_mode<synchronous>, transform_indices = @transform_5, window_bounds = array<i64: 1, 128>}, {pipeline_mode = #tpu.pipeline_mode<synchronous>, transform_indices = @transform_6, window_bounds = array<i64: 1, 1>}, {transform_indices = @transform_7, window_bounds = array<i64: 128, 1>}]} {
    %c0 = arith.constant 0 : index
    %c0_0 = arith.constant 0 : index
    %0 = vector.load %arg1[%c0, %c0_0] : memref<128x32xbf16, #tpu.memory_space<vmem>>, vector<128x32xbf16>
    %c0_1 = arith.constant 0 : index
    %c0_2 = arith.constant 0 : index
    %1 = vector.load %arg3[%c0_1, %c0_2] : memref<32x128xbf16, #tpu.memory_space<vmem>>, vector<32x128xbf16>
    %cst = arith.constant dense<0.000000e+00> : vector<128x128xf32>
    %2 = tpu.matmul %0, %1, %cst {dimension_numbers = #tpu.dot_dimension_numbers<[1], [0], [0], [1], [0, 0, 1, 1], [], []>} : vector<128x32xbf16>, vector<32x128xbf16>, vector<128x128xf32> -> vector<128x128xf32>
    %c0_3 = arith.constant 0 : index
    %c0_4 = arith.constant 0 : index
    %3 = vector.load %arg2[%c0_3, %c0_4] : memref<128x1024xbf16, #tpu.memory_space<vmem>>, vector<128x1024xbf16>
    %c0_5 = arith.constant 0 : index
    %c0_6 = arith.constant 0 : index
    %4 = vector.load %arg4[%c0_5, %c0_6] : memref<1024x128xbf16, #tpu.memory_space<vmem>>, vector<1024x128xbf16>
    %cst_7 = arith.constant dense<0.000000e+00> : vector<128x128xf32>
    %5 = tpu.matmul %3, %4, %cst_7 {dimension_numbers = #tpu.dot_dimension_numbers<[1], [0], [0], [1], [0, 0, 1, 1], [], []>} : vector<128x1024xbf16>, vector<1024x128xbf16>, vector<128x128xf32> -> vector<128x128xf32>
    %6 = arith.addf %2, %5 : vector<128x128xf32>
    %c0_8 = arith.constant 0 : index
    %c0_9 = arith.constant 0 : index
    %7 = vector.load %arg5[%c0_8, %c0_9] : memref<1x128xf32, #tpu.memory_space<vmem>>, vector<1x128xf32>
    %8 = vector.broadcast %7 : vector<1x128xf32> to vector<128x128xf32>
    %9 = arith.addf %6, %8 : vector<128x128xf32>
    %cst_10 = arith.constant 0.000000e+00 : f32
    %10 = vector.broadcast %cst_10 : f32 to vector<128x128xf32>
    %11 = arith.maximumf %9, %10 : vector<128x128xf32>
    %c0_11 = arith.constant 0 : index
    %c0_12 = arith.constant 0 : index
    %12 = vector.load %arg6[%c0_11, %c0_12] : memref<1x128xf32, #tpu.memory_space<vmem>>, vector<1x128xf32>
    %13 = vector.broadcast %12 : vector<1x128xf32> to vector<128x128xf32>
    %14 = arith.mulf %11, %13 : vector<128x128xf32>
    %cst_13 = arith.constant dense<0.000000e+00> : vector<128xf32>
    %15 = vector.multi_reduction <add>, %14, %cst_13 [1] : vector<128x128xf32> to vector<128xf32>
    %16 = vector.shape_cast %15 : vector<128xf32> to vector<128x1xf32>
    %c0_14 = arith.constant 0 : index
    %c0_15 = arith.constant 0 : index
    %17 = vector.load %arg7[%c0_14, %c0_15] : memref<1x1xf32, #tpu.memory_space<vmem>>, vector<1x1xf32>
    %18 = vector.broadcast %17 : vector<1x1xf32> to vector<128x1xf32>
    %19 = arith.addf %16, %18 : vector<128x1xf32>
    %cst_16 = arith.constant 0.000000e+00 : f32
    %20 = vector.broadcast %cst_16 : f32 to vector<128x1xf32>
    %21 = arith.subf %20, %19 : vector<128x1xf32>
    %22 = math.exp %21 : vector<128x1xf32>
    %cst_17 = arith.constant 1.000000e+00 : f32
    %23 = vector.broadcast %cst_17 : f32 to vector<128x1xf32>
    %24 = arith.addf %23, %22 : vector<128x1xf32>
    %25 = tpu.reciprocal %24 {approx = true} : vector<128x1xf32> -> vector<128x1xf32>
    %c0_18 = arith.constant 0 : index
    %c0_19 = arith.constant 0 : index
    %26 = vector.load %arg8[%c0_18, %c0_19] : memref<128x1xf32, #tpu.memory_space<vmem>>, vector<128x1xf32>
    tpu.vector_store %arg8[%c0_18, %c0_19], %25 {strides = array<i32>} : memref<128x1xf32, #tpu.memory_space<vmem>>, vector<128x1xf32>,
    return
  }
  func.func @transform_0(%arg0: i32) -> (i32, i32) {
    %c0_i32 = arith.constant 0 : i32
    %c0_i32_0 = arith.constant 0 : i32
    return %arg0, %c0_i32 : i32, i32
  }
  func.func @transform_1(%arg0: i32) -> (i32, i32) {
    %c0_i32 = arith.constant 0 : i32
    %c0_i32_0 = arith.constant 0 : i32
    return %arg0, %c0_i32 : i32, i32
  }
  func.func @transform_2(%arg0: i32) -> (i32, i32) {
    %c0_i32 = arith.constant 0 : i32
    %c0_i32_0 = arith.constant 0 : i32
    %c0_i32_1 = arith.constant 0 : i32
    return %c0_i32, %c0_i32_0 : i32, i32
  }
  func.func @transform_3(%arg0: i32) -> (i32, i32) {
    %c0_i32 = arith.constant 0 : i32
    %c0_i32_0 = arith.constant 0 : i32
    %c0_i32_1 = arith.constant 0 : i32
    return %c0_i32, %c0_i32_0 : i32, i32
  }
  func.func @transform_4(%arg0: i32) -> (i32, i32) {
    %c0_i32 = arith.constant 0 : i32
    %c0_i32_0 = arith.constant 0 : i32
    %c0_i32_1 = arith.constant 0 : i32
    return %c0_i32, %c0_i32_0 : i32, i32
  }
  func.func @transform_5(%arg0: i32) -> (i32, i32) {
    %c0_i32 = arith.constant 0 : i32
    %c0_i32_0 = arith.constant 0 : i32
    %c0_i32_1 = arith.constant 0 : i32
    return %c0_i32, %c0_i32_0 : i32, i32
  }
  func.func @transform_6(%arg0: i32) -> (i32, i32) {
    %c0_i32 = arith.constant 0 : i32
    %c0_i32_0 = arith.constant 0 : i32
    %c0_i32_1 = arith.constant 0 : i32
    return %c0_i32, %c0_i32_0 : i32, i32
  }
  func.func @transform_7(%arg0: i32) -> (i32, i32) {
    %c0_i32 = arith.constant 0 : i32
    %c0_i32_0 = arith.constant 0 : i32
    return %arg0, %c0_i32 : i32, i32
  }
}

</mosaic_0001>

<bundles_post_ra>
// kernel: tpu_custom_call.1
= control target key start
LH: loop header
LB: loop body
LE: loop exit
PB: predicated region body
PF: predicated region fallthrough
CT: control target
= control target key end

     0   :  { %s2699_s0 = inlined_call_operand.vmem [shape: bf16[128,32], index: 0, kind: input, shape index: {}]   ;;  %s2700_s1 = inlined_call_operand.hbm [shape: bf16[128,1024], index: 1, kind: input, shape index: {}]   ;;  %s2701_s2 = inlined_call_operand.vmem [shape: bf16[32,128], index: 2, kind: input, shape index: {}]   ;;  %s2702_s3 = inlined_call_operand.hbm [shape: bf16[1024,128], index: 3, kind: input, shape index: {}]   ;;  %s2703_s4 = inlined_call_operand.vmem [shape: f32[1,128], index: 4, kind: input, shape index: {}]   ;;  %s2704_s5 = inlined_call_operand.vmem [shape: f32[1,128], index: 5, kind: input, shape index: {}]   ;;  %s2705_s6 = inlined_call_operand.<no memory space> [shape: f32[1,1], index: 6, kind: input, shape index: {}]   ;;  %s2706_s7 = inlined_call_operand.vmem [shape: f32[128,1], index: 7, kind: output, shape index: {}]  }
   0x1   :  { %v12_v0 = vstv %s2705_s6 }
   0x2   :  { %13 = vst [vmem:[#allocation2] sm:$0x1] %v12_v0 }
   0x3   :  { %14 = vsyncpa [#allocation4], 0 }
   0x4   :  { %15 = vsyncpa [#allocation6], 0  ;;  %s2386_s26 = smov [#allocation3]   ;;  %s2338_s30 = scalar_lea.hbm %s2700_s1, 8192 }
   0x5   :  { %s23_s27 = sshll.u32 %s2386_s26, 4  ;;  %p2339_p0 = scmp.ne.s32.totalorder %s2700_s1, %s2338_s30  ;;  %s24_s27 = int_to_ptr.vmem [resolvable:$true] %s23_s27 }
   0x6   :  { %p2342_p1 = scmp.lt.u32.totalorder %s2338_s30, %s2700_s1 }
   0x8   :  { %p2344_p2 = pnand %p2342_p1, %p2339_p0 }
   0xa   :  { %2347 = shalt.err (!%p2344_p2)
}
   0xb   :  { %s2348_s6 = scalar_lea.vmem %s24_s27, 8192  ;;  %p2353_p4 = scmp.lt.s32.totalorder %s24_s27, %s24_s27 }
   0xc   :  { %p2349_p3 = scmp.ne.s32.totalorder %s24_s27, %s2348_s6  ;;  %p2354_p5 = scmp.lt.s32.totalorder %s2348_s6, %s2348_s6 }
   0xe   :  { %p2355_p6 = por %p2354_p5, %p2353_p4 }
  0x10   :  { %p2356_p7 = pnand %p2355_p6, %p2349_p3 }
  0x12   :  { %2359 = shalt.err (!%p2356_p7)
}
  0x13   :  { %s2387_s12 = smov 512   ;;  %s2388_s13 = smov 32  }
  0x14   :  { %29 = dma.hbm_to_vmem [thread:$0]  %s2700_s1, 8192, %s24_s27, [#allocation4], %s2387_s12, %s2387_s12, %s2388_s13  }
  0x15   :  { %s2389_s16 = smov [#allocation5]   ;;  %s2360_s20 = scalar_lea.hbm %s2702_s3, 8192 }
  0x16   :  { %s37_s17 = sshll.u32 %s2389_s16, 4  ;;  %p2361_p8 = scmp.ne.s32.totalorder %s2702_s3, %s2360_s20  ;;  %s38_s17 = int_to_ptr.vmem [resolvable:$true] %s37_s17 }
  0x17   :  { %p2364_p9 = scmp.lt.u32.totalorder %s2360_s20, %s2702_s3 }
  0x19   :  { %p2366_p10 = pnand %p2364_p9, %p2361_p8 }
  0x1b   :  { %2369 = shalt.err (!%p2366_p10)
}
  0x1c   :  { %s2370_s25 = scalar_lea.vmem %s38_s17, 8192  ;;  %p2375_p12 = scmp.lt.s32.totalorder %s38_s17, %s38_s17 }
  0x1d   :  { %p2371_p11 = scmp.ne.s32.totalorder %s38_s17, %s2370_s25  ;;  %p2376_p13 = scmp.lt.s32.totalorder %s2370_s25, %s2370_s25 }
  0x1f   :  { %p2377_p0 = por %p2376_p13, %p2375_p12 }
  0x21   :  { %p2378_p1 = pnand %p2377_p0, %p2371_p11 }
  0x23   :  { %2381 = shalt.err (!%p2378_p1)
}
  0x24   :  { %s2390_s1 = smov 64   ;;  %s2391_s26 = smov 4  }
  0x25   :  { %43 = dma.hbm_to_vmem [thread:$0]  %s2702_s3, 8192, %s38_s17, [#allocation6], %s2390_s1, %s2390_s1, %s2391_s26  }
  0x26   :  { %2382 = dma.done.wait [#allocation4], 8192  }
  0x27   :  { %2383 = vsyncadd [#allocation4], 4294959104 }
  0x28   :  { %2384 = dma.done.wait [#allocation6], 8192  }
  0x29   :  { %2385 = vsyncadd [#allocation6], 4294959104  ;;  %v2200_v1 = vld [vmem:[#allocation5 + $0x40] sm:$0xff]   ;;  %v2204_v5 = vld [vmem:[#allocation5 + $0x48] sm:$0xff]   ;;  %vm1413_vm0 = vcmask 261120   ;;  %vm1732_vm1 = vcmask 7168  }
  0x2a   :  { %v2201_v2 = vld [vmem:[#allocation5 + $0xc0] sm:$0xff]   ;;  %1904 = vmatprep.subr.bf16.mxu0 %v2200_v1  ;;  %v2205_v6 = vld [vmem:[#allocation5 + $0xc8] sm:$0xff]   ;;  %v2208_v9 = vld [vmem:[#allocation5 + $0x50] sm:$0xff]  }
  0x2b   :  { %v2202_v3 = vld [vmem:[#allocation5] sm:$0xff]   ;;  %1968 = vmatprep.subr.bf16.mxu1 %v2201_v2  ;;  %v2206_v7 = vld [vmem:[#allocation5 + $0x8] sm:$0xff]   ;;  %v2209_v10 = vld [vmem:[#allocation5 + $0xd0] sm:$0xff]  }
  0x2c   :  { %v2203_v4 = vld [vmem:[#allocation5 + $0x80] sm:$0xff]   ;;  %1905 = vmatpush3.bf16.msra.mxu0 %v2202_v3  ;;  %v2207_v8 = vld [vmem:[#allocation5 + $0x88] sm:$0xff]   ;;  %v2210_v11 = vld [vmem:[#allocation5 + $0x10] sm:$0xff]  }
  0x2d   :  { %1969 = vmatpush3.bf16.msra.mxu1 %v2203_v4  ;;  %1906 = vmatprep.subr.bf16.mxu0 %v2204_v5  ;;  %v2211_v12 = vld [vmem:[#allocation5 + $0x90] sm:$0xff]   ;;  %v2212_v13 = vld [vmem:[#allocation5 + $0x58] sm:$0xff]   ;;  %v2216_v17 = vld [vmem:[#allocation5 + $0x60] sm:$0xff]  }
  0x2e   :  { %1970 = vmatprep.subr.bf16.mxu1 %v2205_v6  ;;  %v2213_v14 = vld [vmem:[#allocation5 + $0xd8] sm:$0xff]   ;;  %v2217_v18 = vld [vmem:[#allocation5 + $0xe0] sm:$0xff]   ;;  %v2220_v21 = vld [vmem:[#allocation5 + $0x68] sm:$0xff]  }
  0x2f   :  { %v2214_v15 = vld [vmem:[#allocation5 + $0x18] sm:$0xff]   ;;  %v2218_v19 = vld [vmem:[#allocation5 + $0x20] sm:$0xff]   ;;  %v2221_v22 = vld [vmem:[#allocation5 + $0xe8] sm:$0xff]  }
  0x30   :  { %1907 = vmatpush3.bf16.msra.mxu0 %v2206_v7  ;;  %v2215_v16 = vld [vmem:[#allocation5 + $0x98] sm:$0xff]   ;;  %v2219_v20 = vld [vmem:[#allocation5 + $0xa0] sm:$0xff]   ;;  %v2222_v23 = vld [vmem:[#allocation5 + $0x28] sm:$0xff]  }
  0x31   :  { %1971 = vmatpush3.bf16.msra.mxu1 %v2207_v8  ;;  %1908 = vmatprep.subr.bf16.mxu0 %v2208_v9  ;;  %v2223_v24 = vld [vmem:[#allocation5 + $0xa8] sm:$0xff]   ;;  %v2224_v25 = vld [vmem:[#allocation5 + $0x70] sm:$0xff]   ;;  %v2228_v29 = vld [vmem:[#allocation5 + $0x78] sm:$0xff]  }
  0x32   :  { %1972 = vmatprep.subr.bf16.mxu1 %v2209_v10  ;;  %v2225_v26 = vld [vmem:[#allocation5 + $0xf0] sm:$0xff]   ;;  %v2229_v30 = vld [vmem:[#allocation5 + $0xf8] sm:$0xff]   ;;  %v77_v33 = vld [vmem:[#allocation3] sm:$0xff] }
  0x33   :  { %v2226_v27 = vld [vmem:[#allocation5 + $0x30] sm:$0xff]   ;;  %v2230_v31 = vld [vmem:[#allocation5 + $0x38] sm:$0xff]   ;;  %v81_v34 = vld [vmem:[#allocation3 + $0x20] sm:$0xff] }
  0x34   :  { %1909 = vmatpush3.bf16.msra.mxu0 %v2210_v11  ;;  %v2227_v28 = vld [vmem:[#allocation5 + $0xb0] sm:$0xff]   ;;  %v2231_v32 = vld [vmem:[#allocation5 + $0xb8] sm:$0xff]   ;;  %v78_v35 = vld [vmem:[#allocation3 + $0x8] sm:$0xff]  ;;  %v1755_v36 = vcombine.low %v77_v33, %v81_v34  ;;  %v1756_v37 = vcombine.high %v77_v33, %v81_v34 }
  0x35   :  { %1973 = vmatpush3.bf16.msra.mxu1 %v2211_v12  ;;  %1910 = vmatprep.subr.bf16.mxu0 %v2212_v13  ;;  %v82_v38 = vld [vmem:[#allocation3 + $0x28] sm:$0xff]  ;;  %v2232_v41 = vld [vmem:[#allocation5 + $0x140] sm:$0xff]   ;;  %v2240_v63 = vld [vmem:[#allocation5 + $0x150] sm:$0xff]  }
  0x36   :  { %1974 = vmatprep.subr.bf16.mxu1 %v2213_v14  ;;  %v1757_v39 = vcombine.low %v78_v35, %v82_v38  ;;  %v1758_v40 = vcombine.high %v78_v35, %v82_v38  ;;  %1005 = vmatprep.mubr.bf16.mxu0 %v1756_v37  ;;  %v2233_v42 = vld [vmem:[#allocation5 + $0x1c0] sm:$0xff]   ;;  %v86_v48 = vld [vmem:[#allocation3 + $0x48] sm:$0xff]  ;;  %v2241_v0 = vld [vmem:[#allocation5 + $0x1d0] sm:$0xff]  }
  0x37   :  { %v2234_v43 = vld [vmem:[#allocation5 + $0x100] sm:$0xff]   ;;  %v90_v49 = vld [vmem:[#allocation3 + $0x68] sm:$0xff]  ;;  %v2242_v1 = vld [vmem:[#allocation5 + $0x110] sm:$0xff]  }
  0x38   :  { %1911 = vmatpush3.bf16.msra.mxu0 %v2214_v15  ;;  %1102 = vmatprep.mubr.bf16.mxu1 %v1758_v40  ;;  %v2235_v44 = vld [vmem:[#allocation5 + $0x180] sm:$0xff]   ;;  %v1766_v50 = vcombine.high %v86_v48, %v90_v49  ;;  %v2236_v51 = vld [vmem:[#allocation5 + $0x148] sm:$0xff]   ;;  %v1765_v54 = vcombine.low %v86_v48, %v90_v49  ;;  %v2243_v2 = vld [vmem:[#allocation5 + $0x190] sm:$0xff]  }
  0x39   :  { %1975 = vmatpush3.bf16.msra.mxu1 %v2215_v16  ;;  %1912 = vmatprep.subr.bf16.mxu0 %v2216_v17  ;;  %v85_v45 = vld [vmem:[#allocation3 + $0x40] sm:$0xff]  ;;  %v2237_v53 = vld [vmem:[#allocation5 + $0x1c8] sm:$0xff]   ;;  %v2244_v11 = vld [vmem:[#allocation5 + $0x158] sm:$0xff]  }
  0x3a   :  { %1976 = vmatprep.subr.bf16.mxu1 %v2217_v18  ;;  %v89_v46 = vld [vmem:[#allocation3 + $0x60] sm:$0xff]  ;;  %v2238_v55 = vld [vmem:[#allocation5 + $0x108] sm:$0xff]   ;;  %v2245_v12 = vld [vmem:[#allocation5 + $0x1d8] sm:$0xff]  }
  0x3b   :  { %v1764_v47 = vcombine.high %v85_v45, %v89_v46  ;;  %v1763_v52 = vcombine.low %v85_v45, %v89_v46  ;;  %v2239_v56 = vld [vmem:[#allocation5 + $0x188] sm:$0xff]   ;;  %v93_v57 = vld [vmem:[#allocation3 + $0x80] sm:$0xff]  ;;  %v2246_v13 = vld [vmem:[#allocation5 + $0x118] sm:$0xff]  }
  0x3c   :  { %1913 = vmatpush3.bf16.msra.mxu0 %v2218_v19  ;;  %v97_v58 = vld [vmem:[#allocation3 + $0xa0] sm:$0xff]  ;;  %v94_v59 = vld [vmem:[#allocation3 + $0x88] sm:$0xff]  ;;  %v2247_v14 = vld [vmem:[#allocation5 + $0x198] sm:$0xff]  }
  0x3d   :  { %1977 = vmatpush3.bf16.msra.mxu1 %v2219_v20  ;;  %1914 = vmatprep.subr.bf16.mxu0 %v2220_v21  ;;  %v98_v60 = vld [vmem:[#allocation3 + $0xa8] sm:$0xff]  ;;  %v1772_v61 = vcombine.high %v93_v57, %v97_v58  ;;  %v1771_v3 = vcombine.low %v93_v57, %v97_v58  ;;  %v101_v4 = vld [vmem:[#allocation3 + $0xc0] sm:$0xff]  ;;  %v2257_v40 = vld [vmem:[#allocation5 + $0x1f0] sm:$0xff]  }
  0x3e   :  { %1978 = vmatprep.subr.bf16.mxu1 %v2221_v22  ;;  %v1774_v62 = vcombine.high %v94_v59, %v98_v60  ;;  %v105_v5 = vld [vmem:[#allocation3 + $0xe0] sm:$0xff]  ;;  %v102_v6 = vld [vmem:[#allocation3 + $0xc8] sm:$0xff]  ;;  %v1773_v7 = vcombine.low %v94_v59, %v98_v60  ;;  %v2261_v49 = vld [vmem:[#allocation5 + $0x1f8] sm:$0xff]  }
  0x3f   :  { %v1780_v8 = vcombine.high %v101_v4, %v105_v5  ;;  %v106_v9 = vld [vmem:[#allocation3 + $0xe8] sm:$0xff]  ;;  %v109_v15 = vld [vmem:[#allocation3 + $0x100] sm:$0xff]  ;;  %v1779_v20 = vcombine.low %v101_v4, %v105_v5 }
  0x40   :  { %1915 = vmatpush3.bf16.msra.mxu0 %v2222_v23  ;;  %v1782_v10 = vcombine.high %v102_v6, %v106_v9  ;;  %v113_v16 = vld [vmem:[#allocation3 + $0x120] sm:$0xff]  ;;  %v110_v17 = vld [vmem:[#allocation3 + $0x108] sm:$0xff]  ;;  %v1781_v22 = vcombine.low %v102_v6, %v106_v9  ;;  %v91_v9 = vld [vmem:[#allocation3 + $0x70] sm:$0xff] }
  0x41   :  { %1979 = vmatpush3.bf16.msra.mxu1 %v2223_v24  ;;  %1916 = vmatprep.subr.bf16.mxu0 %v2224_v25  ;;  %v114_v18 = vld [vmem:[#allocation3 + $0x128] sm:$0xff]  ;;  %v2248_v19 = vld [vmem:[#allocation5 + $0x160] sm:$0xff]   ;;  %v1788_v23 = vcombine.high %v109_v15, %v113_v16  ;;  %v1787_v35 = vcombine.low %v109_v15, %v113_v16 }
  0x42   :  { %1980 = vmatprep.subr.bf16.mxu1 %v2225_v26  ;;  %v2249_v21 = vld [vmem:[#allocation5 + $0x1e0] sm:$0xff]   ;;  %v1790_v25 = vcombine.high %v110_v17, %v114_v18  ;;  %v2254_v33 = vld [vmem:[#allocation5 + $0x128] sm:$0xff]  }
  0x43   :  { %v2250_v24 = vld [vmem:[#allocation5 + $0x120] sm:$0xff]   ;;  %v2255_v34 = vld [vmem:[#allocation5 + $0x1a8] sm:$0xff]  }
  0x44   :  { %1917 = vmatpush3.bf16.msra.mxu0 %v2226_v27  ;;  %v2251_v26 = vld [vmem:[#allocation5 + $0x1a0] sm:$0xff]   ;;  %v126_v45 = vld [vmem:[#allocation3 + $0x188] sm:$0xff] }
  0x45   :  { %1981 = vmatpush3.bf16.msra.mxu1 %v2227_v28  ;;  %1918 = vmatprep.subr.bf16.mxu0 %v2228_v29  ;;  %v117_v27 = vld [vmem:[#allocation3 + $0x140] sm:$0xff]  ;;  %v2252_v29 = vld [vmem:[#allocation5 + $0x168] sm:$0xff]  }
  0x46   :  { %1982 = vmatprep.subr.bf16.mxu1 %v2229_v30  ;;  %v121_v28 = vld [vmem:[#allocation3 + $0x160] sm:$0xff]  ;;  %v118_v30 = vld [vmem:[#allocation3 + $0x148] sm:$0xff] }
  0x47   :  { %v1796_v37 = vcombine.high %v117_v27, %v121_v28  ;;  %v130_v46 = vld [vmem:[#allocation3 + $0x1a8] sm:$0xff]  ;;  %v1795_v48 = vcombine.low %v117_v27, %v121_v28  ;;  %v137_v57 = vld [vmem:[#allocation3 + $0x1e0] sm:$0xff]  ;;  %v104_v27 = vld [vmem:[#allocation3 + $0xd8] sm:$0xff] }
  0x48   :  { %1919 = vmatpush3.bf16.msra.mxu0 %v2230_v31  ;;  %v122_v31 = vld [vmem:[#allocation3 + $0x168] sm:$0xff]  ;;  %v108_v28 = vld [vmem:[#allocation3 + $0xf8] sm:$0xff] }
  0x49   :  { %1983 = vmatpush3.bf16.msra.mxu1 %v2231_v32  ;;  %2032 = vmatprep.subr.bf16.mxu0 %v2232_v41  ;;  %v2253_v32 = vld [vmem:[#allocation5 + $0x1e8] sm:$0xff]   ;;  %v1798_v38 = vcombine.high %v118_v30, %v122_v31  ;;  %v2258_v41 = vld [vmem:[#allocation5 + $0x130] sm:$0xff]  }
  0x4a   :  { %2096 = vmatprep.subr.bf16.mxu1 %v2233_v42  ;;  %v125_v42 = vld [vmem:[#allocation3 + $0x180] sm:$0xff]  ;;  %v134_v58 = vld [vmem:[#allocation3 + $0x1c8] sm:$0xff] }
  0x4b   :  { %1006 = vmatmul.mubr.bf16.vlgmr.msra.gmra.mrb[0].mxu0 %v1755_v36  ;;  %v1789_v36 = vcombine.low %v110_v17, %v114_v18  ;;  %v138_v59 = vld [vmem:[#allocation3 + $0x1e8] sm:$0xff]  ;;  %v95_v17 = vld [vmem:[#allocation3 + $0x90] sm:$0xff] }
  0x4c   :  { %1103 = vmatmul.mubr.bf16.vlgmr.msra.gmra.mrb[0].mxu1 %v1757_v39  ;;  %2033 = vmatpush3.bf16.msra.mxu0 %v2234_v43  ;;  %v2256_v39 = vld [vmem:[#allocation5 + $0x170] sm:$0xff]   ;;  %v129_v43 = vld [vmem:[#allocation3 + $0x1a0] sm:$0xff]  ;;  %v1813_v5 = vcombine.low %v134_v58, %v138_v59 }
  0x4d   :  { %2097 = vmatpush3.bf16.msra.mxu1 %v2235_v44  ;;  %1013 = vmatprep.mubr.bf16.mxu0 %v1764_v47  ;;  %v2259_v44 = vld [vmem:[#allocation5 + $0x1b0] sm:$0xff]   ;;  %v2260_v47 = vld [vmem:[#allocation5 + $0x178] sm:$0xff]   ;;  %v1803_v60 = vcombine.low %v125_v42, %v129_v43  ;;  %v2265_v16 = vld [vmem:[%s2701_s2 + $0x8] sm:$0xff]  }
  0x4e   :  { %1110 = vmatprep.mubr.bf16.mxu1 %v1766_v50  ;;  %2034 = vmatprep.subr.bf16.mxu0 %v2236_v51  ;;  %v1797_v50 = vcombine.low %v118_v30, %v122_v31  ;;  %v1804_v51 = vcombine.high %v125_v42, %v129_v43  ;;  %v99_v18 = vld [vmem:[#allocation3 + $0xb0] sm:$0xff]  ;;  %v120_v43 = vld [vmem:[#allocation3 + $0x158] sm:$0xff] }
  0x4f   :  { %2098 = vmatprep.subr.bf16.mxu1 %v2237_v53  ;;  %v1806_v53 = vcombine.high %v126_v45, %v130_v46  ;;  %v123_v42 = vld [vmem:[#allocation3 + $0x170] sm:$0xff] }
  0x50   :  { %2035 = vmatpush3.bf16.msra.mxu0 %v2238_v55  ;;  %v2264_v55 = vld [vmem:[%s2701_s2] sm:$0xff]  }
  0x51   :  { %2099 = vmatpush3.bf16.msra.mxu1 %v2239_v56  ;;  %2036 = vmatprep.subr.bf16.mxu0 %v2240_v63  ;;  %v133_v56 = vld [vmem:[#allocation3 + $0x1c0] sm:$0xff]  ;;  %v1814_v63 = vcombine.high %v134_v58, %v138_v59  ;;  %v139_v58 = vld [vmem:[#allocation3 + $0x1f0] sm:$0xff]  ;;  %v136_v59 = vld [vmem:[#allocation3 + $0x1d8] sm:$0xff] }
  0x52   :  { %2100 = vmatprep.subr.bf16.mxu1 %v2241_v0  ;;  %v79_v0 = vld [vmem:[#allocation3 + $0x10] sm:$0xff]  ;;  %v1811_v4 = vcombine.low %v133_v56, %v137_v57 }
  0x53   :  { %1014 = vmatmul.mubr.bf16.gmra.mrb[4].mxu0 %v1763_v52  ;;  %v2262_v52 = vld [vmem:[#allocation5 + $0x138] sm:$0xff]  }
  0x54   :  { %1111 = vmatmul.mubr.bf16.gmra.mrb[4].mxu1 %v1765_v54  ;;  %1021 = vmatprep.mubr.bf16.mxu0 %v1772_v61  ;;  %v2263_v54 = vld [vmem:[#allocation5 + $0x1b8] sm:$0xff]   ;;  %v1805_v61 = vcombine.low %v126_v45, %v130_v46 }
  0x55   :  { %1118 = vmatprep.mubr.bf16.mxu1 %v1774_v62  ;;  %2037 = vmatpush3.bf16.msra.mxu0 %v2242_v1  ;;  %v1812_v62 = vcombine.high %v133_v56, %v137_v57  ;;  %v83_v1 = vld [vmem:[#allocation3 + $0x30] sm:$0xff] }
  0x56   :  { %2101 = vmatpush3.bf16.msra.mxu1 %v2243_v2  ;;  %2038 = vmatprep.subr.bf16.mxu0 %v2244_v11  ;;  %v80_v2 = vld [vmem:[#allocation3 + $0x18] sm:$0xff]  ;;  %v1760_v6 = vcombine.high %v79_v0, %v83_v1  ;;  %v135_v57 = vld [vmem:[#allocation3 + $0x1d0] sm:$0xff] }
  0x57   :  { %2102 = vmatprep.subr.bf16.mxu1 %v2245_v12  ;;  %v88_v11 = vld [vmem:[#allocation3 + $0x58] sm:$0xff] }
  0x58   :  { %v92_v12 = vld [vmem:[#allocation3 + $0x78] sm:$0xff] }
  0x59   :  { %2039 = vmatpush3.bf16.msra.mxu0 %v2246_v13  ;;  %v1770_v15 = vcombine.high %v88_v11, %v92_v12 }
  0x5a   :  { %2103 = vmatpush3.bf16.msra.mxu1 %v2247_v14  ;;  %2040 = vmatprep.subr.bf16.mxu0 %v2248_v19  ;;  %v96_v19 = vld [vmem:[#allocation3 + $0x98] sm:$0xff] }
  0x5b   :  { %1022 = vmatmul.mubr.bf16.gmra.mrb[8].mxu0 %v1771_v3  ;;  %2104 = vmatprep.subr.bf16.mxu1 %v2249_v21  ;;  %v84_v3 = vld [vmem:[#allocation3 + $0x38] sm:$0xff] }
  0x5c   :  { %1119 = vmatmul.mubr.bf16.gmra.mrb[8].mxu1 %v1773_v7  ;;  %1029 = vmatprep.mubr.bf16.mxu0 %v1780_v8  ;;  %v1762_v7 = vcombine.high %v80_v2, %v84_v3  ;;  %v87_v8 = vld [vmem:[#allocation3 + $0x50] sm:$0xff]  ;;  %v1761_v13 = vcombine.low %v80_v2, %v84_v3  ;;  %v2266_v3 = vld [vmem:[%s2699_s0] sm:$0xff]  }
  0x5d   :  { %1126 = vmatprep.mubr.bf16.mxu1 %v1782_v10  ;;  %2041 = vmatpush3.bf16.msra.mxu0 %v2250_v24  ;;  %v1759_v10 = vcombine.low %v79_v0, %v83_v1  ;;  %v1768_v14 = vcombine.high %v87_v8, %v91_v9  ;;  %v1767_v21 = vcombine.low %v87_v8, %v91_v9  ;;  %v2271_v8 = vld [vmem:[%s2699_s0 + $0x30] sm:$0xff]   ;;  %v2272_v9 = vld [vmem:[%s2699_s0 + $0x18] sm:$0xff]  }
  0x5e   :  { %2105 = vmatpush3.bf16.msra.mxu1 %v2251_v26  ;;  %2042 = vmatprep.subr.bf16.mxu0 %v2252_v29  ;;  %v107_v26 = vld [vmem:[#allocation3 + $0xf0] sm:$0xff]  ;;  %v1775_v29 = vcombine.low %v95_v17, %v99_v18  ;;  %v1815_v1 = vcombine.low %v135_v57, %v139_v58 }
  0x5f   :  { %2106 = vmatprep.subr.bf16.mxu1 %v2253_v32  ;;  %v1786_v32 = vcombine.high %v104_v27, %v108_v28 }
  0x61   :  { %2043 = vmatpush3.bf16.msra.mxu0 %v2254_v33  ;;  %v111_v33 = vld [vmem:[#allocation3 + $0x110] sm:$0xff] }
  0x62   :  { %2107 = vmatpush3.bf16.msra.mxu1 %v2255_v34  ;;  %2044 = vmatprep.subr.bf16.mxu0 %v2256_v39  ;;  %v115_v34 = vld [vmem:[#allocation3 + $0x130] sm:$0xff] }
  0x63   :  { %1030 = vmatmul.mubr.bf16.gmra.mrb[12].mxu0 %v1779_v20  ;;  %2108 = vmatprep.subr.bf16.mxu1 %v2257_v40  ;;  %v100_v20 = vld [vmem:[#allocation3 + $0xb8] sm:$0xff]  ;;  %v1792_v39 = vcombine.high %v111_v33, %v115_v34  ;;  %v1791_v45 = vcombine.low %v111_v33, %v115_v34 }
  0x64   :  { %1127 = vmatmul.mubr.bf16.gmra.mrb[12].mxu1 %v1781_v22  ;;  %1037 = vmatprep.mubr.bf16.mxu0 %v1788_v23  ;;  %v1769_v22 = vcombine.low %v88_v11, %v92_v12  ;;  %v1776_v23 = vcombine.high %v95_v17, %v99_v18  ;;  %v1778_v24 = vcombine.high %v96_v19, %v100_v20 }
  0x65   :  { %1134 = vmatprep.mubr.bf16.mxu1 %v1790_v25  ;;  %2045 = vmatpush3.bf16.msra.mxu0 %v2258_v41  ;;  %v103_v25 = vld [vmem:[#allocation3 + $0xd0] sm:$0xff]  ;;  %v1777_v30 = vcombine.low %v96_v19, %v100_v20 }
  0x66   :  { %2109 = vmatpush3.bf16.msra.mxu1 %v2259_v44  ;;  %2046 = vmatprep.subr.bf16.mxu0 %v2260_v47  ;;  %v1784_v31 = vcombine.high %v103_v25, %v107_v26  ;;  %v119_v41 = vld [vmem:[#allocation3 + $0x150] sm:$0xff]  ;;  %v124_v44 = vld [vmem:[#allocation3 + $0x178] sm:$0xff] }
  0x67   :  { %2110 = vmatprep.subr.bf16.mxu1 %v2261_v49  ;;  %v1800_v47 = vcombine.high %v119_v41, %v123_v42  ;;  %v127_v49 = vld [vmem:[#allocation3 + $0x190] sm:$0xff] }
  0x69   :  { %2047 = vmatpush3.bf16.msra.mxu0 %v2262_v52  ;;  %v132_v52 = vld [vmem:[#allocation3 + $0x1b8] sm:$0xff] }
  0x6a   :  { %2111 = vmatpush3.bf16.msra.mxu1 %v2263_v54  ;;  %2170 = vmatprep.subr.bf16.mxu0 %v2264_v55  ;;  %v1801_v54 = vcombine.low %v120_v43, %v124_v44 }
  0x6b   :  { %1038 = vmatmul.mubr.bf16.gmra.mrb[16].mxu0 %v1787_v35  ;;  %2190 = vmatprep.subr.bf16.mxu1 %v2264_v55  ;;  %v112_v35 = vld [vmem:[#allocation3 + $0x118] sm:$0xff] }
  0x6c   :  { %1135 = vmatmul.mubr.bf16.gmra.mrb[16].mxu1 %v1789_v36  ;;  %1045 = vmatprep.mubr.bf16.mxu0 %v1796_v37  ;;  %v116_v36 = vld [vmem:[#allocation3 + $0x138] sm:$0xff]  ;;  %v1783_v37 = vcombine.low %v103_v25, %v107_v26 }
  0x6d   :  { %1142 = vmatprep.mubr.bf16.mxu1 %v1798_v38  ;;  %v1785_v38 = vcombine.low %v104_v27, %v108_v28  ;;  %v1794_v40 = vcombine.high %v112_v35, %v116_v36  ;;  %v1793_v46 = vcombine.low %v112_v35, %v116_v36 }
  0x73   :  { %1046 = vmatmul.mubr.bf16.gmra.mrb[20].mxu0 %v1795_v48  ;;  %v1802_v48 = vcombine.high %v120_v43, %v124_v44 }
  0x74   :  { %1143 = vmatmul.mubr.bf16.gmra.mrb[20].mxu1 %v1797_v50  ;;  %1053 = vmatprep.mubr.bf16.mxu0 %v1804_v51  ;;  %v131_v50 = vld [vmem:[#allocation3 + $0x1b0] sm:$0xff]  ;;  %v128_v51 = vld [vmem:[#allocation3 + $0x198] sm:$0xff] }
  0x75   :  { %1150 = vmatprep.mubr.bf16.mxu1 %v1806_v53  ;;  %v1799_v53 = vcombine.low %v119_v41, %v123_v42  ;;  %v1810_v56 = vcombine.high %v128_v51, %v132_v52 }
  0x7b   :  { %1054 = vmatmul.mubr.bf16.gmra.mrb[24].mxu0 %v1803_v60  ;;  %v140_v60 = vld [vmem:[#allocation3 + $0x1f8] sm:$0xff] }
  0x7c   :  { %1151 = vmatmul.mubr.bf16.gmra.mrb[24].mxu1 %v1805_v61  ;;  %1061 = vmatprep.mubr.bf16.mxu0 %v1812_v62  ;;  %v1807_v61 = vcombine.low %v127_v49, %v131_v50  ;;  %v1809_v62 = vcombine.low %v128_v51, %v132_v52  ;;  %v1818_v0 = vcombine.high %v136_v59, %v140_v60 }
  0x7d   :  { %1158 = vmatprep.mubr.bf16.mxu1 %v1814_v63  ;;  %v1816_v63 = vcombine.high %v135_v57, %v139_v58  ;;  %v1817_v2 = vcombine.low %v136_v59, %v140_v60 }
  0x83   :  { %1062 = vmatmul.mubr.bf16.gmra.mrb[28].mxu0 %v1811_v4  ;;  %v2267_v4 = vld [vmem:[%s2699_s0 + $0x20] sm:$0xff]  }
  0x84   :  { %1159 = vmatmul.mubr.bf16.gmra.mrb[28].mxu1 %v1813_v5  ;;  %1199 = vmatprep.mubr.bf16.mxu0 %v1760_v6  ;;  %v2268_v5 = vld [vmem:[%s2699_s0 + $0x8] sm:$0xff]  }
  0x85   :  { %1296 = vmatprep.mubr.bf16.mxu1 %v1762_v7  ;;  %v2269_v6 = vld [vmem:[%s2699_s0 + $0x28] sm:$0xff]   ;;  %v2270_v7 = vld [vmem:[%s2699_s0 + $0x10] sm:$0xff]  }
  0x8b   :  { %1200 = vmatmul.mubr.bf16.vlgmr.msra.gmra.mrb[32].mxu0 %v1759_v10  ;;  %v2273_v10 = vld [vmem:[%s2699_s0 + $0x38] sm:$0xff]  }
  0x8c   :  { %1297 = vmatmul.mubr.bf16.vlgmr.msra.gmra.mrb[32].mxu1 %v1761_v13  ;;  %2171 = vmatpush3.bf16.msra.mxu0 %v2264_v55 }
  0x8d   :  { %2192 = vmatpush3.bf16.msra.mxu1 %v2264_v55  ;;  %1207 = vmatprep.mubr.bf16.mxu0 %v1768_v14  ;;  %v1808_v55 = vcombine.high %v127_v49, %v131_v50 }
  0x8e   :  { %1304 = vmatprep.mubr.bf16.mxu1 %v1770_v15  ;;  %2172 = vmatprep.subr.bf16.mxu0 %v2265_v16 }
  0x8f   :  { %2191 = vmatprep.subr.bf16.mxu1 %v2265_v16 }
  0x90   :  { %2173 = vmatpush3.bf16.msra.mxu0 %v2265_v16 }
  0x91   :  { %2193 = vmatpush3.bf16.msra.mxu1 %v2265_v16 }
  0x93   :  { %1208 = vmatmul.mubr.bf16.gmra.mrb[36].mxu0 %v1767_v21 }
  0x94   :  { %1305 = vmatmul.mubr.bf16.gmra.mrb[36].mxu1 %v1769_v22  ;;  %1215 = vmatprep.mubr.bf16.mxu0 %v1776_v23 }
  0x95   :  { %1312 = vmatprep.mubr.bf16.mxu1 %v1778_v24 }
  0x9b   :  { %1216 = vmatmul.mubr.bf16.gmra.mrb[40].mxu0 %v1775_v29 }
  0x9c   :  { %1313 = vmatmul.mubr.bf16.gmra.mrb[40].mxu1 %v1777_v30  ;;  %1223 = vmatprep.mubr.bf16.mxu0 %v1784_v31 }
  0x9d   :  { %1320 = vmatprep.mubr.bf16.mxu1 %v1786_v32 }
  0xa3   :  { %1224 = vmatmul.mubr.bf16.gmra.mrb[44].mxu0 %v1783_v37 }
  0xa4   :  { %1321 = vmatmul.mubr.bf16.gmra.mrb[44].mxu1 %v1785_v38  ;;  %1231 = vmatprep.mubr.bf16.mxu0 %v1792_v39 }
  0xa5   :  { %1328 = vmatprep.mubr.bf16.mxu1 %v1794_v40 }
  0xab   :  { %1232 = vmatmul.mubr.bf16.gmra.mrb[48].mxu0 %v1791_v45 }
  0xac   :  { %1329 = vmatmul.mubr.bf16.gmra.mrb[48].mxu1 %v1793_v46  ;;  %1239 = vmatprep.mubr.bf16.mxu0 %v1800_v47 }
  0xad   :  { %1336 = vmatprep.mubr.bf16.mxu1 %v1802_v48 }
  0xb3   :  { %1240 = vmatmul.mubr.bf16.gmra.mrb[52].mxu0 %v1799_v53 }
  0xb4   :  { %1337 = vmatmul.mubr.bf16.gmra.mrb[52].mxu1 %v1801_v54  ;;  %1247 = vmatprep.mubr.bf16.mxu0 %v1808_v55 }
  0xb5   :  { %1344 = vmatprep.mubr.bf16.mxu1 %v1810_v56 }
  0xbb   :  { %1248 = vmatmul.mubr.bf16.gmra.mrb[56].mxu0 %v1807_v61 }
  0xbc   :  { %1345 = vmatmul.mubr.bf16.gmra.mrb[56].mxu1 %v1809_v62  ;;  %1255 = vmatprep.mubr.bf16.mxu0 %v1816_v63 }
  0xbd   :  { %1352 = vmatprep.mubr.bf16.mxu1 %v1818_v0 }
  0xc3   :  { %1256 = vmatmul.mubr.bf16.gmra.mrb[60].mxu0 %v1815_v1 }
  0xc4   :  { %1353 = vmatmul.mubr.bf16.gmra.mrb[60].mxu1 %v1817_v2  ;;  %2174 = vmatprep.mubr.msk.bf16.mxu0 %vm1413_vm0, %v2266_v3 }
  0xc5   :  { %2182 = vmatprep.mubr.msk.bf16.mxu1 %vm1413_vm0, %v2267_v4 }
  0xcb   :  { %2175 = vmatmul.mubr.msk.bf16.vlgmr.msra.gmra.mrb[64].mxu0 %vm1413_vm0, %v2268_v5 }
  0xcc   :  { %2183 = vmatmul.mubr.msk.bf16.vlgmr.msra.gmra.mrb[64].mxu1 %vm1413_vm0, %v2269_v6  ;;  %2178 = vmatprep.mubr.msk.bf16.mxu0 %vm1413_vm0, %v2270_v7 }
  0xcd   :  { %2186 = vmatprep.mubr.msk.bf16.mxu1 %vm1413_vm0, %v2271_v8 }
  0xd3   :  { %2179 = vmatmul.mubr.msk.bf16.gmra.mrb[68].mxu0 %vm1413_vm0, %v2272_v9 }
  0xd4   :  { %2187 = vmatmul.mubr.msk.bf16.gmra.mrb[68].mxu1 %vm1413_vm0, %v2273_v10 }
 0x11e   :  { %v1920_v11 = vpop.f32.mrb[0].mxu0 }
 0x11f   :  { %v1984_v12 = vpop.f32.mrb[0].mxu1  ;;  %v1921_v13 = vpop.f32.mrb[1].mxu0 }
 0x120   :  { %v1922_v14 = vadd.f32 %v1921_v13, %v1920_v11  ;;  %v1985_v15 = vpop.f32.mrb[1].mxu1  ;;  %v1923_v16 = vpop.f32.mrb[2].mxu0 }
 0x121   :  { %v1986_v17 = vadd.f32 %v1985_v15, %v1984_v12  ;;  %v1987_v18 = vpop.f32.mrb[2].mxu1  ;;  %v1924_v19 = vpop.f32.mrb[3].mxu0 }
 0x122   :  { %v1925_v20 = vadd.f32 %v1924_v19, %v1923_v16  ;;  %v1988_v21 = vpop.f32.mrb[3].mxu1 }
 0x123   :  { %v2497_v22 = vadd.f32 %v1986_v17, %v1922_v14  ;;  %v1989_v23 = vadd.f32 %v1988_v21, %v1987_v18 }
 0x125   :  { %v2499_v24 = vadd.f32 %v1989_v23, %v1925_v20 }
 0x126   :  { %v1926_v25 = vpop.f32.mrb[4].mxu0 }
 0x127   :  { %v1990_v26 = vpop.f32.mrb[4].mxu1  ;;  %v1927_v27 = vpop.f32.mrb[5].mxu0 }
 0x128   :  { %v1928_v28 = vadd.f32 %v1927_v27, %v1926_v25  ;;  %v1991_v29 = vpop.f32.mrb[5].mxu1  ;;  %v1929_v30 = vpop.f32.mrb[6].mxu0 }
 0x129   :  { %v1992_v31 = vadd.f32 %v1991_v29, %v1990_v26  ;;  %v1993_v32 = vpop.f32.mrb[6].mxu1  ;;  %v1930_v33 = vpop.f32.mrb[7].mxu0 }
 0x12a   :  { %v1931_v34 = vadd.f32 %v1930_v33, %v1929_v30  ;;  %v1994_v35 = vpop.f32.mrb[7].mxu1 }
 0x12b   :  { %v2501_v36 = vadd.f32 %v1992_v31, %v1928_v28  ;;  %v1995_v37 = vadd.f32 %v1994_v35, %v1993_v32 }
 0x12d   :  { %v2503_v38 = vadd.f32 %v1995_v37, %v1931_v34 }
 0x12e   :  { %v1932_v39 = vpop.f32.mrb[8].mxu0 }
 0x12f   :  { %v1996_v40 = vpop.f32.mrb[8].mxu1  ;;  %v1933_v41 = vpop.f32.mrb[9].mxu0 }
 0x130   :  { %v1934_v42 = vadd.f32 %v1933_v41, %v1932_v39  ;;  %v1997_v43 = vpop.f32.mrb[9].mxu1  ;;  %v1935_v44 = vpop.f32.mrb[10].mxu0 }
 0x131   :  { %v1998_v45 = vadd.f32 %v1997_v43, %v1996_v40  ;;  %v1999_v46 = vpop.f32.mrb[10].mxu1  ;;  %v1936_v47 = vpop.f32.mrb[11].mxu0 }
 0x132   :  { %v1937_v48 = vadd.f32 %v1936_v47, %v1935_v44  ;;  %v2000_v49 = vpop.f32.mrb[11].mxu1 }
 0x133   :  { %v2505_v50 = vadd.f32 %v1998_v45, %v1934_v42  ;;  %v2001_v51 = vadd.f32 %v2000_v49, %v1999_v46 }
 0x135   :  { %v2507_v52 = vadd.f32 %v2001_v51, %v1937_v48 }
 0x136   :  { %v1938_v53 = vpop.f32.mrb[12].mxu0 }
 0x137   :  { %v2002_v54 = vpop.f32.mrb[12].mxu1  ;;  %v1939_v55 = vpop.f32.mrb[13].mxu0 }
 0x138   :  { %v1940_v56 = vadd.f32 %v1939_v55, %v1938_v53  ;;  %v2003_v57 = vpop.f32.mrb[13].mxu1  ;;  %v1941_v58 = vpop.f32.mrb[14].mxu0 }
 0x139   :  { %v2004_v59 = vadd.f32 %v2003_v57, %v2002_v54  ;;  %v2005_v60 = vpop.f32.mrb[14].mxu1  ;;  %v1942_v61 = vpop.f32.mrb[15].mxu0 }
 0x13a   :  { %v1943_v62 = vadd.f32 %v1942_v61, %v1941_v58  ;;  %v2006_v63 = vpop.f32.mrb[15].mxu1 }
 0x13b   :  { %v2509_v0 = vadd.f32 %v2004_v59, %v1940_v56  ;;  %v2007_v1 = vadd.f32 %v2006_v63, %v2005_v60 }
 0x13d   :  { %v2511_v2 = vadd.f32 %v2007_v1, %v1943_v62 }
 0x13e   :  { %v1944_v3 = vpop.f32.mrb[16].mxu0 }
 0x13f   :  { %v2008_v4 = vpop.f32.mrb[16].mxu1  ;;  %v1945_v5 = vpop.f32.mrb[17].mxu0 }
 0x140   :  { %v1946_v6 = vadd.f32 %v1945_v5, %v1944_v3  ;;  %v2009_v7 = vpop.f32.mrb[17].mxu1  ;;  %v1947_v8 = vpop.f32.mrb[18].mxu0 }
 0x141   :  { %v2010_v9 = vadd.f32 %v2009_v7, %v2008_v4  ;;  %v2011_v10 = vpop.f32.mrb[18].mxu1  ;;  %v1948_v11 = vpop.f32.mrb[19].mxu0 }
 0x142   :  { %v1949_v12 = vadd.f32 %v1948_v11, %v1947_v8  ;;  %v2012_v13 = vpop.f32.mrb[19].mxu1 }
 0x143   :  { %v2513_v14 = vadd.f32 %v2010_v9, %v1946_v6  ;;  %v2013_v15 = vadd.f32 %v2012_v13, %v2011_v10 }
 0x145   :  { %v2515_v16 = vadd.f32 %v2013_v15, %v1949_v12 }
 0x146   :  { %v1950_v17 = vpop.f32.mrb[20].mxu0 }
 0x147   :  { %v2014_v18 = vpop.f32.mrb[20].mxu1  ;;  %v1951_v19 = vpop.f32.mrb[21].mxu0 }
 0x148   :  { %v1952_v20 = vadd.f32 %v1951_v19, %v1950_v17  ;;  %v2015_v21 = vpop.f32.mrb[21].mxu1  ;;  %v1953_v23 = vpop.f32.mrb[22].mxu0 }
 0x149   :  { %v2016_v25 = vadd.f32 %v2015_v21, %v2014_v18  ;;  %v2017_v26 = vpop.f32.mrb[22].mxu1  ;;  %v1954_v27 = vpop.f32.mrb[23].mxu0 }
 0x14a   :  { %v1955_v28 = vadd.f32 %v1954_v27, %v1953_v23  ;;  %v2018_v29 = vpop.f32.mrb[23].mxu1 }
 0x14b   :  { %v2517_v30 = vadd.f32 %v2016_v25, %v1952_v20  ;;  %v2019_v31 = vadd.f32 %v2018_v29, %v2017_v26 }
 0x14d   :  { %v2519_v32 = vadd.f32 %v2019_v31, %v1955_v28 }
 0x14e   :  { %v1956_v33 = vpop.f32.mrb[24].mxu0 }
 0x14f   :  { %v2020_v34 = vpop.f32.mrb[24].mxu1  ;;  %v1957_v35 = vpop.f32.mrb[25].mxu0 }
 0x150   :  { %v1958_v37 = vadd.f32 %v1957_v35, %v1956_v33  ;;  %v2021_v39 = vpop.f32.mrb[25].mxu1  ;;  %v1959_v40 = vpop.f32.mrb[26].mxu0 }
 0x151   :  { %v2022_v41 = vadd.f32 %v2021_v39, %v2020_v34  ;;  %v2023_v42 = vpop.f32.mrb[26].mxu1  ;;  %v1960_v43 = vpop.f32.mrb[27].mxu0 }
 0x152   :  { %v1961_v44 = vadd.f32 %v1960_v43, %v1959_v40  ;;  %v2024_v45 = vpop.f32.mrb[27].mxu1 }
 0x153   :  { %v2521_v46 = vadd.f32 %v2022_v41, %v1958_v37  ;;  %v2025_v47 = vadd.f32 %v2024_v45, %v2023_v42 }
 0x155   :  { %v2523_v48 = vadd.f32 %v2025_v47, %v1961_v44 }
 0x156   :  { %v1962_v49 = vpop.f32.mrb[28].mxu0 }
 0x157   :  { %v2026_v51 = vpop.f32.mrb[28].mxu1  ;;  %v1963_v53 = vpop.f32.mrb[29].mxu0 }
 0x158   :  { %v1964_v54 = vadd.f32 %v1963_v53, %v1962_v49  ;;  %v2027_v55 = vpop.f32.mrb[29].mxu1  ;;  %v1965_v56 = vpop.f32.mrb[30].mxu0 }
 0x159   :  { %v2028_v57 = vadd.f32 %v2027_v55, %v2026_v51  ;;  %v2029_v58 = vpop.f32.mrb[30].mxu1  ;;  %v1966_v59 = vpop.f32.mrb[31].mxu0 }
 0x15a   :  { %v1967_v60 = vadd.f32 %v1966_v59, %v1965_v56  ;;  %v2030_v61 = vpop.f32.mrb[31].mxu1 }
 0x15b   :  { %v2525_v62 = vadd.f32 %v2028_v57, %v1964_v54  ;;  %v2031_v63 = vadd.f32 %v2030_v61, %v2029_v58 }
 0x15d   :  { %v2527_v1 = vadd.f32 %v2031_v63, %v1967_v60 }
 0x15e   :  { %v2048_v3 = vpop.f32.mrb[32].mxu0 }
 0x15f   :  { %v2112_v4 = vpop.f32.mrb[32].mxu1  ;;  %v2049_v5 = vpop.f32.mrb[33].mxu0 }
 0x160   :  { %v2050_v6 = vadd.f32 %v2049_v5, %v2048_v3  ;;  %v2113_v7 = vpop.f32.mrb[33].mxu1  ;;  %v2051_v8 = vpop.f32.mrb[34].mxu0 }
 0x161   :  { %v2114_v9 = vadd.f32 %v2113_v7, %v2112_v4  ;;  %v2115_v10 = vpop.f32.mrb[34].mxu1  ;;  %v2052_v11 = vpop.f32.mrb[35].mxu0 }
 0x162   :  { %v1202_v12 = vadd.f32 %v2050_v6, %v2497_v22  ;;  %v2053_v13 = vadd.f32 %v2052_v11, %v2051_v8  ;;  %v2116_v15 = vpop.f32.mrb[35].mxu1 }
 0x163   :  { %v2117_v17 = vadd.f32 %v2116_v15, %v2115_v10 }
 0x164   :  { %v1205_v18 = vadd.f32 %v2053_v13, %v2499_v24  ;;  %v2531_v19 = vadd.f32 %v2114_v9, %v1202_v12 }
 0x166   :  { %v2054_v20 = vpop.f32.mrb[36].mxu0  ;;  %v2533_v21 = vadd.f32 %v2117_v17, %v1205_v18 }
 0x167   :  { %v2118_v23 = vpop.f32.mrb[36].mxu1  ;;  %v2055_v25 = vpop.f32.mrb[37].mxu0 }
 0x168   :  { %v2056_v26 = vadd.f32 %v2055_v25, %v2054_v20  ;;  %v2119_v27 = vpop.f32.mrb[37].mxu1  ;;  %v2057_v28 = vpop.f32.mrb[38].mxu0 }
 0x169   :  { %v2120_v29 = vadd.f32 %v2119_v27, %v2118_v23  ;;  %v2121_v31 = vpop.f32.mrb[38].mxu1  ;;  %v2058_v33 = vpop.f32.mrb[39].mxu0 }
 0x16a   :  { %v1210_v22 = vadd.f32 %v2056_v26, %v2501_v36  ;;  %v2059_v34 = vadd.f32 %v2058_v33, %v2057_v28  ;;  %v2122_v35 = vpop.f32.mrb[39].mxu1 }
 0x16b   :  { %v2123_v37 = vadd.f32 %v2122_v35, %v2121_v31 }
 0x16c   :  { %v1213_v24 = vadd.f32 %v2059_v34, %v2503_v38  ;;  %v2537_v39 = vadd.f32 %v2120_v29, %v1210_v22 }
 0x16e   :  { %v2060_v40 = vpop.f32.mrb[40].mxu0  ;;  %v2539_v41 = vadd.f32 %v2123_v37, %v1213_v24 }
 0x16f   :  { %v2124_v42 = vpop.f32.mrb[40].mxu1  ;;  %v2061_v43 = vpop.f32.mrb[41].mxu0 }
 0x170   :  { %v2062_v44 = vadd.f32 %v2061_v43, %v2060_v40  ;;  %v2125_v45 = vpop.f32.mrb[41].mxu1  ;;  %v2063_v47 = vpop.f32.mrb[42].mxu0 }
 0x171   :  { %v2126_v49 = vadd.f32 %v2125_v45, %v2124_v42  ;;  %v2127_v51 = vpop.f32.mrb[42].mxu1  ;;  %v2064_v53 = vpop.f32.mrb[43].mxu0 }
 0x172   :  { %v1218_v36 = vadd.f32 %v2062_v44, %v2505_v50  ;;  %v2065_v54 = vadd.f32 %v2064_v53, %v2063_v47  ;;  %v2128_v55 = vpop.f32.mrb[43].mxu1 }
 0x173   :  { %v2129_v56 = vadd.f32 %v2128_v55, %v2127_v51 }
 0x174   :  { %v1221_v38 = vadd.f32 %v2065_v54, %v2507_v52  ;;  %v2543_v57 = vadd.f32 %v2126_v49, %v1218_v36 }
 0x176   :  { %v2066_v58 = vpop.f32.mrb[44].mxu0  ;;  %v2545_v59 = vadd.f32 %v2129_v56, %v1221_v38 }
 0x177   :  { %v2130_v60 = vpop.f32.mrb[44].mxu1  ;;  %v2067_v61 = vpop.f32.mrb[45].mxu0 }
 0x178   :  { %v2068_v63 = vadd.f32 %v2067_v61, %v2066_v58  ;;  %v2131_v3 = vpop.f32.mrb[45].mxu1  ;;  %v2069_v4 = vpop.f32.mrb[46].mxu0 }
 0x179   :  { %v2132_v5 = vadd.f32 %v2131_v3, %v2130_v60  ;;  %v2133_v6 = vpop.f32.mrb[46].mxu1  ;;  %v2070_v7 = vpop.f32.mrb[47].mxu0 }
 0x17a   :  { %v1226_v50 = vadd.f32 %v2068_v63, %v2509_v0  ;;  %v2071_v8 = vadd.f32 %v2070_v7, %v2069_v4  ;;  %v2134_v9 = vpop.f32.mrb[47].mxu1 }
 0x17b   :  { %v2135_v10 = vadd.f32 %v2134_v9, %v2133_v6 }
 0x17c   :  { %v1229_v52 = vadd.f32 %v2071_v8, %v2511_v2  ;;  %v2549_v11 = vadd.f32 %v2132_v5, %v1226_v50 }
 0x17e   :  { %v2072_v12 = vpop.f32.mrb[48].mxu0  ;;  %v2551_v13 = vadd.f32 %v2135_v10, %v1229_v52 }
 0x17f   :  { %v2136_v15 = vpop.f32.mrb[48].mxu1  ;;  %v2073_v17 = vpop.f32.mrb[49].mxu0 }
 0x180   :  { %v2074_v18 = vadd.f32 %v2073_v17, %v2072_v12  ;;  %v2137_v20 = vpop.f32.mrb[49].mxu1  ;;  %v2075_v23 = vpop.f32.mrb[50].mxu0 }
 0x181   :  { %v2138_v25 = vadd.f32 %v2137_v20, %v2136_v15  ;;  %v2139_v26 = vpop.f32.mrb[50].mxu1  ;;  %v2076_v27 = vpop.f32.mrb[51].mxu0 }
 0x182   :  { %v1234_v0 = vadd.f32 %v2074_v18, %v2513_v14  ;;  %v2077_v28 = vadd.f32 %v2076_v27, %v2075_v23  ;;  %v2140_v29 = vpop.f32.mrb[51].mxu1 }
 0x183   :  { %v2141_v31 = vadd.f32 %v2140_v29, %v2139_v26 }
 0x184   :  { %v1237_v2 = vadd.f32 %v2077_v28, %v2515_v16  ;;  %v1331_v33 = vadd.f32 %v2138_v25, %v1234_v0  ;;  %v2568_v28 = vld [vmem:[%s2703_s4] ss:$0 sm:$0xff] }
 0x186   :  { %v2078_v22 = vpop.f32.mrb[52].mxu0  ;;  %v2555_v34 = vadd.f32 %v2141_v31, %v1237_v2 }
 0x187   :  { %v2142_v35 = vpop.f32.mrb[52].mxu1  ;;  %v2079_v37 = vpop.f32.mrb[53].mxu0 }
 0x188   :  { %v2080_v24 = vadd.f32 %v2079_v37, %v2078_v22  ;;  %v2143_v40 = vpop.f32.mrb[53].mxu1  ;;  %v2081_v42 = vpop.f32.mrb[54].mxu0 }
 0x189   :  { %v2144_v43 = vadd.f32 %v2143_v40, %v2142_v35  ;;  %v2145_v44 = vpop.f32.mrb[54].mxu1  ;;  %v2082_v45 = vpop.f32.mrb[55].mxu0 }
 0x18a   :  { %v1242_v47 = vadd.f32 %v2080_v24, %v2517_v30  ;;  %v2083_v14 = vadd.f32 %v2082_v45, %v2081_v42  ;;  %v2146_v49 = vpop.f32.mrb[55].mxu1 }
 0x18b   :  { %v2147_v51 = vadd.f32 %v2146_v49, %v2145_v44 }
 0x18c   :  { %v1245_v53 = vadd.f32 %v2083_v14, %v2519_v32  ;;  %v1339_v16 = vadd.f32 %v2144_v43, %v1242_v47 }
 0x18e   :  { %v2084_v36 = vpop.f32.mrb[56].mxu0  ;;  %v1342_v54 = vadd.f32 %v2147_v51, %v1245_v53 }
 0x18f   :  { %v2148_v55 = vpop.f32.mrb[56].mxu1  ;;  %v2085_v56 = vpop.f32.mrb[57].mxu0 }
 0x190   :  { %v2086_v38 = vadd.f32 %v2085_v56, %v2084_v36  ;;  %v2149_v58 = vpop.f32.mrb[57].mxu1  ;;  %v2087_v60 = vpop.f32.mrb[58].mxu0 }
 0x191   :  { %v2150_v61 = vadd.f32 %v2149_v58, %v2148_v55  ;;  %v2151_v63 = vpop.f32.mrb[58].mxu1  ;;  %v2088_v3 = vpop.f32.mrb[59].mxu0 }
 0x192   :  { %v1250_v4 = vadd.f32 %v2086_v38, %v2521_v46  ;;  %v2089_v5 = vadd.f32 %v2088_v3, %v2087_v60  ;;  %v2152_v30 = vpop.f32.mrb[59].mxu1 }
 0x193   :  { %v2153_v6 = vadd.f32 %v2152_v30, %v2151_v63 }
 0x194   :  { %v1253_v7 = vadd.f32 %v2089_v5, %v2523_v48  ;;  %v1347_v50 = vadd.f32 %v2150_v61, %v1250_v4 }
 0x196   :  { %v2090_v32 = vpop.f32.mrb[60].mxu0  ;;  %v2561_v8 = vadd.f32 %v2153_v6, %v1253_v7 }
 0x197   :  { %v2154_v9 = vpop.f32.mrb[60].mxu1  ;;  %v2091_v10 = vpop.f32.mrb[61].mxu0 }
 0x198   :  { %v2092_v52 = vadd.f32 %v2091_v10, %v2090_v32  ;;  %v2155_v12 = vpop.f32.mrb[61].mxu1  ;;  %v2093_v15 = vpop.f32.mrb[62].mxu0 }
 0x199   :  { %v2156_v17 = vadd.f32 %v2155_v12, %v2154_v9  ;;  %v2157_v18 = vpop.f32.mrb[62].mxu1  ;;  %v2094_v20 = vpop.f32.mrb[63].mxu0 }
 0x19a   :  { %v1258_v23 = vadd.f32 %v2092_v52, %v2525_v62  ;;  %v2095_v46 = vadd.f32 %v2094_v20, %v2093_v15  ;;  %v2158_v25 = vpop.f32.mrb[63].mxu1 }
 0x19b   :  { %v2159_v26 = vadd.f32 %v2158_v25, %v2157_v18 }
 0x19c   :  { %v1261_v27 = vadd.f32 %v2095_v46, %v2527_v1  ;;  %v1355_v48 = vadd.f32 %v2156_v17, %v1258_v23 }
 0x19e   :  { %v2176_v0 = vpop.f32.mrb[64].mxu0  ;;  %v1358_v29 = vadd.f32 %v2159_v26, %v1261_v27 }
 0x19f   :  { %v1481_v31 = vadd.f32 %v2176_v0, %v2537_v39  ;;  %v2184_v2 = vpop.f32.mrb[64].mxu1  ;;  %v1472_v22 = vpop.f32.mrb[65].mxu0 }
 0x1a0   :  { %v1513_v35 = vadd.f32 %v2184_v2, %v1339_v16  ;;  %v1473_v62 = vadd.f32 %v1472_v22, %v2531_v19  ;;  %v1504_v37 = vpop.f32.mrb[65].mxu1  ;;  %v2177_v24 = vpop.f32.mrb[66].mxu0  ;;  %v2580_v19 = vld [vmem:[%s2704_s5] ss:$0 sm:$0xff] }
 0x1a1   :  { %v1505_v40 = vadd.f32 %v1504_v37, %v1331_v33  ;;  %v1484_v1 = vadd.f32 %v2177_v24, %v2539_v41  ;;  %v2185_v42 = vpop.f32.mrb[66].mxu1  ;;  %v1475_v43 = vpop.f32.mrb[67].mxu0  ;;  %v1544_v44 = vadd.f32 %v2568_v28, %v1481_v31 }
 0x1a2   :  { %v1542_v45 = vadd.f32 %v2568_v28, %v1473_v62  ;;  %v1516_v47 = vadd.f32 %v2185_v42, %v1342_v54  ;;  %v1476_v14 = vadd.f32 %v1475_v43, %v2533_v21  ;;  %v1507_v39 = vpop.f32.mrb[67].mxu1  ;;  %v1552_v49 = vadd.f32 %v2568_v28, %v1513_v35 }
 0x1a3   :  { %v1545_v33 = vadd.f32 %v2568_v28, %v1484_v1  ;;  %v1508_v41 = vadd.f32 %v1507_v39, %v2555_v34  ;;  %v1560_v51 = vmax.f32 %v1544_v44, 0.0  ;;  %v1550_v55 = vadd.f32 %v2568_v28, %v1505_v40 }
 0x1a4   :  { %v1568_v53 = vmax.f32 %v1552_v49, 0.0  ;;  %v1553_v36 = vadd.f32 %v2568_v28, %v1516_v47  ;;  %v1558_v21 = vmax.f32 %v1542_v45, 0.0  ;;  %v1543_v34 = vadd.f32 %v2568_v28, %v1476_v14 }
 0x1a5   :  { %v1561_v16 = vmax.f32 %v1545_v33, 0.0  ;;  %v1583_v54 = vmul.f32 %v2580_v19, %v1560_v51  ;;  %v1551_v63 = vadd.f32 %v2568_v28, %v1508_v41  ;;  %v1566_v52 = vmax.f32 %v1550_v55, 0.0 }
 0x1a6   :  { %v2180_v56 = vpop.f32.mrb[68].mxu0  ;;  %v1591_v38 = vmul.f32 %v2580_v19, %v1568_v53  ;;  %v1569_v6 = vmax.f32 %v1553_v36, 0.0  ;;  %v1581_v18 = vmul.f32 %v2580_v19, %v1558_v21  ;;  %v1559_v23 = vmax.f32 %v1543_v34, 0.0 }
 0x1a7   :  { %v1497_v58 = vadd.f32 %v2180_v56, %v2549_v11  ;;  %v2188_v60 = vpop.f32.mrb[68].mxu1  ;;  %1601 = vadd.xlane.f32.xlu1 %v1583_v54  ;;  %v1488_v61 = vpop.f32.mrb[69].mxu0  ;;  %v1584_v11 = vmul.f32 %v2580_v19, %v1561_v16  ;;  %v1589_v25 = vmul.f32 %v2580_v19, %v1566_v52 }
 0x1a8   :  { %v1529_v3 = vadd.f32 %v2188_v60, %v1355_v48  ;;  %1617 = vadd.xlane.f32.xlu0 %v1591_v38  ;;  %v1520_v4 = vpop.f32.mrb[69].mxu1  ;;  %v1489_v5 = vadd.f32 %v1488_v61, %v2543_v57  ;;  %v2181_v30 = vpop.f32.mrb[70].mxu0  ;;  %v1567_v57 = vmax.f32 %v1551_v63, 0.0  ;;  %v1582_v0 = vmul.f32 %v2580_v19, %v1559_v23 }
 0x1a9   :  { %v1521_v7 = vadd.f32 %v1520_v4, %v1347_v50  ;;  %v1500_v32 = vadd.f32 %v2181_v30, %v2551_v13  ;;  %v2189_v9 = vpop.f32.mrb[70].mxu1  ;;  %v1491_v10 = vpop.f32.mrb[71].mxu0  ;;  %v1592_v13 = vmul.f32 %v2580_v19, %v1569_v6  ;;  %v1548_v46 = vadd.f32 %v2568_v28, %v1497_v58 }
 0x1aa   :  { %v1532_v12 = vadd.f32 %v2189_v9, %v1358_v29  ;;  %v1492_v15 = vadd.f32 %v1491_v10, %v2545_v59  ;;  %v1523_v17 = vpop.f32.mrb[71].mxu1  ;;  %v1590_v27 = vmul.f32 %v2580_v19, %v1567_v57  ;;  %v1546_v48 = vadd.f32 %v2568_v28, %v1489_v5 }
 0x1ab   :  { %v1524_v20 = vadd.f32 %v1523_v17, %v2561_v8  ;;  %1603 = vadd.xlane.f32.xlu1 %v1584_v11  ;;  %v1549_v50 = vadd.f32 %v2568_v28, %v1500_v32  ;;  %v1564_v8 = vmax.f32 %v1548_v46, 0.0  ;;  %v1554_v22 = vadd.f32 %v2568_v28, %v1521_v7 }
 0x1ac   :  { %1597 = vadd.xlane.f32.xlu0 %v1581_v18  ;;  %v1547_v26 = vadd.f32 %v2568_v28, %v1492_v15  ;;  %v1562_v35 = vmax.f32 %v1546_v48, 0.0  ;;  %v1557_v37 = vadd.f32 %v2568_v28, %v1532_v12  ;;  %v1556_v1 = vadd.f32 %v2568_v28, %v1529_v3 }
 0x1ad   :  { %v1565_v59 = vmax.f32 %v1549_v50, 0.0  ;;  %v1555_v31 = vadd.f32 %v2568_v28, %v1524_v20  ;;  %v1587_v62 = vmul.f32 %v2580_v19, %v1564_v8  ;;  %v1570_v42 = vmax.f32 %v1554_v22, 0.0  ;;  %v2617_v28 = vld [vmem:[#allocation2] ss:$0 sm:$0xff] }
 0x1ae   :  { %v1563_v29 = vmax.f32 %v1547_v26, 0.0  ;;  %v1585_v43 = vmul.f32 %v2580_v19, %v1562_v35  ;;  %v1573_v44 = vmax.f32 %v1557_v37, 0.0  ;;  %v1572_v47 = vmax.f32 %v1556_v1, 0.0 }
 0x1af   :  { %1619 = vadd.xlane.f32.xlu1 %v1592_v13  ;;  %v1588_v2 = vmul.f32 %v2580_v19, %v1565_v59  ;;  %v1571_v24 = vmax.f32 %v1555_v31, 0.0  ;;  %v1593_v14 = vmul.f32 %v2580_v19, %v1570_v42 }
 0x1b0   :  { %1613 = vadd.xlane.f32.xlu0 %v1589_v25  ;;  %v1586_v40 = vmul.f32 %v2580_v19, %v1563_v29  ;;  %v1596_v39 = vmul.f32 %v2580_v19, %v1573_v44  ;;  %v1595_v49 = vmul.f32 %v2580_v19, %v1572_v47 }
 0x1b1   :  { %v1594_v45 = vmul.f32 %v2580_v19, %v1571_v24 }
 0x1b3   :  { %1615 = vadd.xlane.f32.xlu1 %v1590_v27 }
 0x1b4   :  { %1599 = vadd.xlane.f32.xlu0 %v1582_v0 }
 0x1b7   :  { %1611 = vadd.xlane.f32.xlu1 %v1588_v2 }
 0x1b8   :  { %1609 = vadd.xlane.f32.xlu0 %v1587_v62 }
 0x1bb   :  { %1607 = vadd.xlane.f32.xlu1 %v1586_v40 }
 0x1bc   :  { %1605 = vadd.xlane.f32.xlu0 %v1585_v43 }
 0x1bf   :  { %1623 = vadd.xlane.f32.xlu1 %v1594_v45 }
 0x1c0   :  { %1621 = vadd.xlane.f32.xlu0 %v1593_v14 }
 0x1c3   :  { %1627 = vadd.xlane.f32.xlu1 %v1596_v39 }
 0x1c4   :  { %1625 = vadd.xlane.f32.xlu0 %v1595_v49 }
 0x234   :  { %v1602_v33 = vpop.xlane.xlu1 %1601 }
 0x235   :  { %v1618_v41 = vpop.xlane.xlu0 %1617  ;;  %v1638_v51 = vadd.f32 %v2617_v28, %v1602_v33 }
 0x236   :  { %v1646_v53 = vadd.f32 %v2617_v28, %v1618_v41 }
 0x237   :  { %v1654_v16 = vsub.f32 0.0, %v1638_v51 }
 0x238   :  { %v1662_v36 = vsub.f32 0.0, %v1646_v53  ;;  %v1604_v54 = vpop.xlane.xlu1 %1603 }
 0x239   :  { %v1672_v21 = vmul.f32 1.442695, %v1654_v16  ;;  %v1639_v55 = vadd.f32 %v2617_v28, %v1604_v54  ;;  %v1598_v56 = vpop.xlane.xlu0 %1597 }
 0x23a   :  { %v1688_v38 = vmul.f32 1.442695, %v1662_v36  ;;  %v1636_v19 = vadd.f32 %v2617_v28, %v1598_v56 }
 0x23b   :  { %2274 = vpow2.f32 %v1672_v21  ;;  %v1655_v58 = vsub.f32 0.0, %v1639_v55 }
 0x23c   :  { %2276 = vpow2.f32 %v1688_v38  ;;  %v1652_v60 = vsub.f32 0.0, %v1636_v19  ;;  %v1620_v61 = vpop.xlane.xlu1 %1619 }
 0x23d   :  { %v1674_v34 = vmul.f32 1.442695, %v1655_v58  ;;  %v1647_v63 = vadd.f32 %v2617_v28, %v1620_v61  ;;  %v1614_v3 = vpop.xlane.xlu0 %1613 }
 0x23e   :  { %v1668_v4 = vmul.f32 1.442695, %v1652_v60  ;;  %v1644_v5 = vadd.f32 %v2617_v28, %v1614_v3 }
 0x23f   :  { %2278 = vpow2.f32 %v1674_v34  ;;  %v1663_v30 = vsub.f32 0.0, %v1647_v63 }
 0x240   :  { %2280 = vpow2.f32 %v1668_v4  ;;  %v1660_v6 = vsub.f32 0.0, %v1644_v5  ;;  %v1616_v7 = vpop.xlane.xlu1 %1615 }
 0x241   :  { %v1690_v32 = vmul.f32 1.442695, %v1663_v30  ;;  %v1645_v9 = vadd.f32 %v2617_v28, %v1616_v7  ;;  %v1600_v10 = vpop.xlane.xlu0 %1599 }
 0x242   :  { %v1684_v11 = vmul.f32 1.442695, %v1660_v6  ;;  %v1637_v52 = vadd.f32 %v2617_v28, %v1600_v10 }
 0x243   :  { %2282 = vpow2.f32 %v1690_v32  ;;  %v1661_v12 = vsub.f32 0.0, %v1645_v9 }
 0x244   :  { %2284 = vpow2.f32 %v1684_v11  ;;  %v1653_v15 = vsub.f32 0.0, %v1637_v52  ;;  %v1612_v17 = vpop.xlane.xlu1 %1611 }
 0x245   :  { %v2275_v18 = vpop.eup %2274  ;;  %v1686_v20 = vmul.f32 1.442695, %v1661_v12  ;;  %v1643_v57 = vadd.f32 %v2617_v28, %v1612_v17  ;;  %v1610_v50 = vpop.xlane.xlu0 %1609 }
 0x246   :  { %v2277_v13 = vpop.eup %2276  ;;  %v1702_v23 = vadd.f32 1.0, %v2275_v18  ;;  %v1670_v46 = vmul.f32 1.442695, %v1653_v15  ;;  %v1642_v25 = vadd.f32 %v2617_v28, %v1610_v50 }
 0x247   :  { %v1710_v59 = vadd.f32 1.0, %v2277_v13  ;;  %2286 = vpow2.f32 %v1686_v20  ;;  %v1659_v26 = vsub.f32 0.0, %v1643_v57 }
 0x248   :  { %2288 = vrcp.f32 %v1702_v23  ;;  %v1658_v27 = vsub.f32 0.0, %v1642_v25  ;;  %v1608_v8 = vpop.xlane.xlu1 %1607 }
 0x249   :  { %v2279_v48 = vpop.eup %2278  ;;  %2290 = vrcp.f32 %v1710_v59  ;;  %v1682_v0 = vmul.f32 1.442695, %v1659_v26  ;;  %v1641_v29 = vadd.f32 %v2617_v28, %v1608_v8  ;;  %v1606_v31 = vpop.xlane.xlu0 %1605 }
 0x24a   :  { %v2281_v2 = vpop.eup %2280  ;;  %v1703_v22 = vadd.f32 1.0, %v2279_v48  ;;  %2292 = vpow2.f32 %v1670_v46  ;;  %v1680_v35 = vmul.f32 1.442695, %v1658_v27  ;;  %v1640_v62 = vadd.f32 %v2617_v28, %v1606_v31 }
 0x24b   :  { %v1700_v37 = vadd.f32 1.0, %v2281_v2  ;;  %2294 = vpow2.f32 %v1682_v0  ;;  %v1657_v24 = vsub.f32 0.0, %v1641_v29 }
 0x24c   :  { %2296 = vrcp.f32 %v1703_v22  ;;  %v1656_v40 = vsub.f32 0.0, %v1640_v62  ;;  %v1624_v1 = vpop.xlane.xlu1 %1623 }
 0x24d   :  { %v2283_v42 = vpop.eup %2282  ;;  %2298 = vrcp.f32 %v1700_v37  ;;  %v1678_v43 = vmul.f32 1.442695, %v1657_v24  ;;  %v1649_v44 = vadd.f32 %v2617_v28, %v1624_v1  ;;  %v1622_v45 = vpop.xlane.xlu0 %1621 }
 0x24e   :  { %v2285_v47 = vpop.eup %2284  ;;  %v1711_v14 = vadd.f32 1.0, %v2283_v42  ;;  %2300 = vpow2.f32 %v1680_v35  ;;  %v1676_v39 = vmul.f32 1.442695, %v1656_v40  ;;  %v1648_v49 = vadd.f32 %v2617_v28, %v1622_v45 }
 0x24f   :  { %v1708_v33 = vadd.f32 1.0, %v2285_v47  ;;  %2302 = vpow2.f32 %v1678_v43  ;;  %v1665_v41 = vsub.f32 0.0, %v1649_v44 }
 0x250   :  { %2304 = vrcp.f32 %v1711_v14  ;;  %v1664_v51 = vsub.f32 0.0, %v1648_v49  ;;  %v1628_v53 = vpop.xlane.xlu1 %1627 }
 0x251   :  { %v2287_v16 = vpop.eup %2286  ;;  %2306 = vrcp.f32 %v1708_v33  ;;  %v1694_v36 = vmul.f32 1.442695, %v1665_v41  ;;  %v1651_v54 = vadd.f32 %v2617_v28, %v1628_v53  ;;  %v1626_v21 = vpop.xlane.xlu0 %1625 }
 0x252   :  { %v2289_v55 = vpop.eup %2288  ;;  %v1709_v56 = vadd.f32 1.0, %v2287_v16  ;;  %2308 = vpow2.f32 %v1676_v39  ;;  %v1692_v38 = vmul.f32 1.442695, %v1664_v51  ;;  %v1650_v19 = vadd.f32 %v2617_v28, %v1626_v21 }
 0x253   :  { %v2291_v58 = vpop.eup %2290  ;;  %1735 = vst.msk [vmem:[%s2706_s7 + $0x10] sm:$0xff] %vm1732_vm1, %v2289_v55  ;;  %2310 = vpow2.f32 %v1694_v36  ;;  %v1667_v60 = vsub.f32 0.0, %v1651_v54 }
 0x254   :  { %v2293_v61 = vpop.eup %2292  ;;  %1743 = vst.msk [vmem:[%s2706_s7 + $0x50] sm:$0xff] %vm1732_vm1, %v2291_v58  ;;  %2312 = vrcp.f32 %v1709_v56  ;;  %v1666_v34 = vsub.f32 0.0, %v1650_v19 }
 0x255   :  { %v2295_v63 = vpop.eup %2294  ;;  %v1701_v3 = vadd.f32 1.0, %v2293_v61  ;;  %2314 = vpow2.f32 %v1692_v38  ;;  %v1698_v28 = vmul.f32 1.442695, %v1667_v60 }
 0x256   :  { %v2297_v4 = vpop.eup %2296  ;;  %v1707_v5 = vadd.f32 1.0, %v2295_v63  ;;  %v1696_v30 = vmul.f32 1.442695, %v1666_v34 }
 0x257   :  { %v2299_v6 = vpop.eup %2298  ;;  %1736 = vst.msk [vmem:[%s2706_s7 + $0x18] sm:$0xff] %vm1732_vm1, %v2297_v4  ;;  %2316 = vrcp.f32 %v1701_v3 }
 0x258   :  { %v2301_v7 = vpop.eup %2300  ;;  %1733 = vst.msk [vmem:[%s2706_s7] sm:$0xff] %vm1732_vm1, %v2299_v6  ;;  %2318 = vrcp.f32 %v1707_v5 }
 0x259   :  { %v2303_v32 = vpop.eup %2302  ;;  %v1706_v9 = vadd.f32 1.0, %v2301_v7  ;;  %2320 = vpow2.f32 %v1698_v28 }
 0x25a   :  { %v2305_v10 = vpop.eup %2304  ;;  %v1705_v11 = vadd.f32 1.0, %v2303_v32  ;;  %2322 = vpow2.f32 %v1696_v30 }
 0x25b   :  { %v2307_v52 = vpop.eup %2306  ;;  %1744 = vst.msk [vmem:[%s2706_s7 + $0x58] sm:$0xff] %vm1732_vm1, %v2305_v10  ;;  %2324 = vrcp.f32 %v1706_v9 }
 0x25c   :  { %v2309_v12 = vpop.eup %2308  ;;  %1741 = vst.msk [vmem:[%s2706_s7 + $0x40] sm:$0xff] %vm1732_vm1, %v2307_v52  ;;  %2326 = vrcp.f32 %v1705_v11 }
 0x25d   :  { %v2311_v15 = vpop.eup %2310  ;;  %v1704_v17 = vadd.f32 1.0, %v2309_v12 }
 0x25e   :  { %v2313_v18 = vpop.eup %2312  ;;  %v1713_v20 = vadd.f32 1.0, %v2311_v15 }
 0x25f   :  { %v2315_v57 = vpop.eup %2314  ;;  %1742 = vst.msk [vmem:[%s2706_s7 + $0x48] sm:$0xff] %vm1732_vm1, %v2313_v18  ;;  %2328 = vrcp.f32 %v1704_v17 }
 0x260   :  { %2330 = vrcp.f32 %v1713_v20  ;;  %v1712_v50 = vadd.f32 1.0, %v2315_v57 }
 0x261   :  { %v2317_v13 = vpop.eup %2316 }
 0x262   :  { %v2319_v23 = vpop.eup %2318  ;;  %1734 = vst.msk [vmem:[%s2706_s7 + $0x8] sm:$0xff] %vm1732_vm1, %v2317_v13  ;;  %2332 = vrcp.f32 %v1712_v50 }
 0x263   :  { %v2321_v46 = vpop.eup %2320  ;;  %1740 = vst.msk [vmem:[%s2706_s7 + $0x38] sm:$0xff] %vm1732_vm1, %v2319_v23 }
 0x264   :  { %v2323_v25 = vpop.eup %2322  ;;  %v1715_v59 = vadd.f32 1.0, %v2321_v46 }
 0x265   :  { %v2325_v26 = vpop.eup %2324  ;;  %v1714_v27 = vadd.f32 1.0, %v2323_v25 }
 0x266   :  { %v2327_v8 = vpop.eup %2326  ;;  %1739 = vst.msk [vmem:[%s2706_s7 + $0x30] sm:$0xff] %vm1732_vm1, %v2325_v26  ;;  %2334 = vrcp.f32 %v1715_v59 }
 0x267   :  { %1738 = vst.msk [vmem:[%s2706_s7 + $0x28] sm:$0xff] %vm1732_vm1, %v2327_v8  ;;  %2336 = vrcp.f32 %v1714_v27 }
 0x269   :  { %v2329_v48 = vpop.eup %2328 }
 0x26a   :  { %v2331_v0 = vpop.eup %2330  ;;  %1737 = vst.msk [vmem:[%s2706_s7 + $0x20] sm:$0xff] %vm1732_vm1, %v2329_v48 }
 0x26b   :  { %1746 = vst.msk [vmem:[%s2706_s7 + $0x68] sm:$0xff] %vm1732_vm1, %v2331_v0 }
 0x26c   :  { %v2333_v29 = vpop.eup %2332 }
 0x26d   :  { %1745 = vst.msk [vmem:[%s2706_s7 + $0x60] sm:$0xff] %vm1732_vm1, %v2333_v29 }
 0x270   :  { %v2335_v31 = vpop.eup %2334 }
 0x271   :  { %v2337_v2 = vpop.eup %2336  ;;  %1748 = vst.msk [vmem:[%s2706_s7 + $0x78] sm:$0xff] %vm1732_vm1, %v2335_v31 }
 0x272   :  { %1747 = vst.msk [vmem:[%s2706_s7 + $0x70] sm:$0xff] %vm1732_vm1, %v2337_v2 }
 0x273   :  { %1753 = vsyncpa [#allocation4], 1 }
 0x274   :  { %1754 = vsyncpa [#allocation6], 1 }

</bundles_post_ra>
